<compile_context>
chip_gen: v6e
topology: v6e:2x2x1
jax: 0.10.0
libtpu: 0.0.40
codegen_flags: <defaults>
</compile_context>

<pallas_src>
import functools

import jax
import jax.numpy as jnp
from jax.experimental import pallas as pl
from jax.experimental.pallas import tpu as pltpu


def _fused2_linear_kernel(x0_ref, x1_ref, w0_ref, w1_ref, b0_ref, b1_ref,
                          o0_ref, o1_ref):
    """One (tm, N) output tile for each of the two modules: y = x @ W + b."""
    # x*_ref: (tm, K)   w*_ref: (K, N)   b*_ref: (1, N)   o*_ref: (tm, N)
    acc0 = jnp.dot(x0_ref[...], w0_ref[...], preferred_element_type=jnp.float32)
    o0_ref[...] = (acc0 + b0_ref[...]).astype(o0_ref.dtype)
    acc1 = jnp.dot(x1_ref[...], w1_ref[...], preferred_element_type=jnp.float32)
    o1_ref[...] = (acc1 + b1_ref[...]).astype(o1_ref.dtype)


@functools.partial(jax.jit, static_argnames=("tm",))
def fused_parallel_linear(x0, x1, w0_t, w1_t, b0, b1, *, tm):
    """Apply two independent linear layers in one pallas_call.

    x0, x1:     (M, K)  compute dtype (bf16 or f32)
    w0_t, w1_t: (K, N)  compute dtype (pre-transposed nn.Linear weights)
    b0, b1:     (1, N)  float32
    returns (o0, o1), each (M, N) float32.
    """
    M, K = x0.shape
    _, N = w0_t.shape
    grid = (pl.cdiv(M, tm),)

    itemsize_x = jnp.dtype(x0.dtype).itemsize
    itemsize_w = jnp.dtype(w0_t.dtype).itemsize
    bytes_accessed = (
        2 * M * K * itemsize_x        # both x streams
        + 2 * K * N * itemsize_w      # both weight slabs (DMA'd once)
        + 2 * N * 4                   # biases
        + 2 * M * N * 4               # both f32 outputs
    )
    cost = pl.CostEstimate(
        flops=2 * 2 * M * K * N, transcendentals=0, bytes_accessed=bytes_accessed
    )

    x_spec = pl.BlockSpec((tm, K), lambda i: (i, 0))
    # Constant-in-i -> DMA'd once, stays VMEM-resident across all M tiles.
    w_spec = pl.BlockSpec((K, N), lambda i: (0, 0))
    b_spec = pl.BlockSpec((1, N), lambda i: (0, 0))
    o_spec = pl.BlockSpec((tm, N), lambda i: (i, 0))

    return pl.pallas_call(
        _fused2_linear_kernel,
        out_shape=(
            jax.ShapeDtypeStruct((M, N), jnp.float32),
            jax.ShapeDtypeStruct((M, N), jnp.float32),
        ),
        grid_spec=pltpu.PrefetchScalarGridSpec(
            num_scalar_prefetch=0,
            grid=grid,
            in_specs=[x_spec, x_spec, w_spec, w_spec, b_spec, b_spec],
            out_specs=(o_spec, o_spec),
        ),
        compiler_params=pltpu.CompilerParams(
            # Independent output row-tiles: shard across TCs on v7x megacore.
            dimension_semantics=("parallel",),
        ),
        cost_estimate=cost,
    )(x0, x1, w0_t, w1_t, b0, b1)


class ModuleParallelFC:
    """JAX/Pallas port of ModuleParallel_fc (two independent Linear layers)."""

    N_PARALLEL = 2

    def __init__(self, key, in_features=2048, out_features=60,
                 compute_dtype=jnp.bfloat16):
        self.in_features = in_features
        self.out_features = out_features
        self.compute_dtype = compute_dtype

        bound = 1.0 / (in_features ** 0.5)
        self.torch_like_params = []  # (W (out,in) f32, b (out,) f32) for reference
        self.w_t = []                # (K, N) compute_dtype, pre-transposed
        self.b = []                  # (1, N) float32
        for i in range(self.N_PARALLEL):
            kw, kb = jax.random.split(jax.random.fold_in(key, i))
            # PyTorch nn.Linear default init: U(-1/sqrt(in), 1/sqrt(in))
            w = jax.random.uniform(
                kw, (out_features, in_features), jnp.float32, -bound, bound
            )
            b = jax.random.uniform(
                kb, (out_features,), jnp.float32, -bound, bound
            )
            self.torch_like_params.append((w, b))
            self.w_t.append(jnp.asarray(w.T, dtype=compute_dtype))
            self.b.append(b.reshape(1, out_features))

    def __call__(self, x_parallel):
        assert len(x_parallel) == self.N_PARALLEL
        x0 = x_parallel[0].astype(self.compute_dtype)
        x1 = x_parallel[1].astype(self.compute_dtype)
        M = x0.shape[0]
        # 512 keeps the double-buffered bf16/f32 footprint under v5e's 16 MiB
        # default scoped VMEM; v6e/v7x could use 1024 with bf16 inputs.
        tm = min(M, 512)
        o0, o1 = fused_parallel_linear(
            x0, x1, self.w_t[0], self.w_t[1], self.b[0], self.b[1], tm=tm
        )
        return [o0, o1]


if __name__ == "__main__":
    # Small shapes consistent with the module (batch, in_features) -> out_features;
    # out_features=60 deliberately exercises the non-128-multiple N path.
    batch, in_features, out_features = 8, 256, 60

    key = jax.random.PRNGKey(0)
    k0, k1, kparam = jax.random.split(key, 3)
    x_parallel = [
        jax.random.normal(k0, (batch, in_features), jnp.float32),
        jax.random.normal(k1, (batch, in_features), jnp.float32),
    ]

    # Default bf16 data path (perf config).
    module_bf16 = ModuleParallelFC(
        kparam, in_features=in_features, out_features=out_features,
        compute_dtype=jnp.bfloat16,
    )
    outs_bf16 = [jax.block_until_ready(o) for o in module_bf16(x_parallel)]

    # f32 path for tight bit-parity with the reference.
    module_f32 = ModuleParallelFC(
        kparam, in_features=in_features, out_features=out_features,
        compute_dtype=jnp.float32,
    )
    outs_f32 = [jax.block_until_ready(o) for o in module_f32(x_parallel)]

    # Pure-JAX reference check (x @ W^T + b semantics of nn.Linear).
    for x, (w, b), o_bf16, o_f32 in zip(
        x_parallel, module_f32.torch_like_params, outs_bf16, outs_f32
    ):
        ref = x @ w.T + b
        assert o_f32.shape == (batch, out_features)
        assert o_bf16.shape == (batch, out_features)
        assert jnp.allclose(o_f32, ref, atol=1e-4, rtol=1e-4)
        # bf16 inputs with f32 accumulation: looser tolerance.
        assert jnp.allclose(o_bf16, ref, atol=2e-2, rtol=2e-2)

    print("KERNEL_OK")
</pallas_src>

<mosaic_0001>
module attributes {stable_mosaic.version = 11 : i64} {
  func.func @_fused2_linear_kernel(%arg0: i32, %arg1: memref<8x256xbf16, #tpu.memory_space<vmem>>, %arg2: memref<8x256xbf16, #tpu.memory_space<vmem>>, %arg3: memref<256x60xbf16, #tpu.memory_space<vmem>>, %arg4: memref<256x60xbf16, #tpu.memory_space<vmem>>, %arg5: memref<1x60xf32, #tpu.memory_space<vmem>>, %arg6: memref<1x60xf32, #tpu.memory_space<vmem>>, %arg7: memref<8x60xf32, #tpu.memory_space<vmem>>, %arg8: memref<8x60xf32, #tpu.memory_space<vmem>>) attributes {dimension_semantics = [#tpu.dimension_semantics<parallel>], iteration_bounds = array<i64: 1>, scalar_prefetch = 0 : i64, scratch_operands = 0 : i64, tpu.core_type = #tpu.core_type<tc>, window_params = [{transform_indices = @transform_0, window_bounds = array<i64: 8, 256>}, {transform_indices = @transform_1, window_bounds = array<i64: 8, 256>}, {pipeline_mode = #tpu.pipeline_mode<synchronous>, transform_indices = @transform_2, window_bounds = array<i64: 256, 60>}, {pipeline_mode = #tpu.pipeline_mode<synchronous>, transform_indices = @transform_3, window_bounds = array<i64: 256, 60>}, {pipeline_mode = #tpu.pipeline_mode<synchronous>, transform_indices = @transform_4, window_bounds = array<i64: 1, 60>}, {pipeline_mode = #tpu.pipeline_mode<synchronous>, transform_indices = @transform_5, window_bounds = array<i64: 1, 60>}, {transform_indices = @transform_6, window_bounds = array<i64: 8, 60>}, {transform_indices = @transform_7, window_bounds = array<i64: 8, 60>}]} {
    %c0 = arith.constant 0 : index
    %c0_0 = arith.constant 0 : index
    %0 = vector.load %arg1[%c0, %c0_0] : memref<8x256xbf16, #tpu.memory_space<vmem>>, vector<8x256xbf16>
    %c0_1 = arith.constant 0 : index
    %c0_2 = arith.constant 0 : index
    %1 = vector.load %arg3[%c0_1, %c0_2] : memref<256x60xbf16, #tpu.memory_space<vmem>>, vector<256x60xbf16>
    %cst = arith.constant dense<0.000000e+00> : vector<8x60xf32>
    %2 = tpu.matmul %0, %1, %cst {dimension_numbers = #tpu.dot_dimension_numbers<[1], [0], [0], [1], [0, 0, 1, 1], [], []>} : vector<8x256xbf16>, vector<256x60xbf16>, vector<8x60xf32> -> vector<8x60xf32>
    %c0_3 = arith.constant 0 : index
    %c0_4 = arith.constant 0 : index
    %3 = vector.load %arg5[%c0_3, %c0_4] : memref<1x60xf32, #tpu.memory_space<vmem>>, vector<1x60xf32>
    %4 = vector.broadcast %3 : vector<1x60xf32> to vector<8x60xf32>
    %5 = arith.addf %2, %4 : vector<8x60xf32>
    %c0_5 = arith.constant 0 : index
    %c0_6 = arith.constant 0 : index
    %6 = vector.load %arg7[%c0_5, %c0_6] : memref<8x60xf32, #tpu.memory_space<vmem>>, vector<8x60xf32>
    tpu.vector_store %arg7[%c0_5, %c0_6], %5 {strides = array<i32>} : memref<8x60xf32, #tpu.memory_space<vmem>>, vector<8x60xf32>,
    %c0_7 = arith.constant 0 : index
    %c0_8 = arith.constant 0 : index
    %7 = vector.load %arg2[%c0_7, %c0_8] : memref<8x256xbf16, #tpu.memory_space<vmem>>, vector<8x256xbf16>
    %c0_9 = arith.constant 0 : index
    %c0_10 = arith.constant 0 : index
    %8 = vector.load %arg4[%c0_9, %c0_10] : memref<256x60xbf16, #tpu.memory_space<vmem>>, vector<256x60xbf16>
    %cst_11 = arith.constant dense<0.000000e+00> : vector<8x60xf32>
    %9 = tpu.matmul %7, %8, %cst_11 {dimension_numbers = #tpu.dot_dimension_numbers<[1], [0], [0], [1], [0, 0, 1, 1], [], []>} : vector<8x256xbf16>, vector<256x60xbf16>, vector<8x60xf32> -> vector<8x60xf32>
    %c0_12 = arith.constant 0 : index
    %c0_13 = arith.constant 0 : index
    %10 = vector.load %arg6[%c0_12, %c0_13] : memref<1x60xf32, #tpu.memory_space<vmem>>, vector<1x60xf32>
    %11 = vector.broadcast %10 : vector<1x60xf32> to vector<8x60xf32>
    %12 = arith.addf %9, %11 : vector<8x60xf32>
    %c0_14 = arith.constant 0 : index
    %c0_15 = arith.constant 0 : index
    %13 = vector.load %arg8[%c0_14, %c0_15] : memref<8x60xf32, #tpu.memory_space<vmem>>, vector<8x60xf32>
    tpu.vector_store %arg8[%c0_14, %c0_15], %12 {strides = array<i32>} : memref<8x60xf32, #tpu.memory_space<vmem>>, vector<8x60xf32>,
    return
  }
  func.func @transform_0(%arg0: i32) -> (i32, i32) {
    %c0_i32 = arith.constant 0 : i32
    %c0_i32_0 = arith.constant 0 : i32
    return %arg0, %c0_i32 : i32, i32
  }
  func.func @transform_1(%arg0: i32) -> (i32, i32) {
    %c0_i32 = arith.constant 0 : i32
    %c0_i32_0 = arith.constant 0 : i32
    return %arg0, %c0_i32 : i32, i32
  }
  func.func @transform_2(%arg0: i32) -> (i32, i32) {
    %c0_i32 = arith.constant 0 : i32
    %c0_i32_0 = arith.constant 0 : i32
    %c0_i32_1 = arith.constant 0 : i32
    return %c0_i32, %c0_i32_0 : i32, i32
  }
  func.func @transform_3(%arg0: i32) -> (i32, i32) {
    %c0_i32 = arith.constant 0 : i32
    %c0_i32_0 = arith.constant 0 : i32
    %c0_i32_1 = arith.constant 0 : i32
    return %c0_i32, %c0_i32_0 : i32, i32
  }
  func.func @transform_4(%arg0: i32) -> (i32, i32) {
    %c0_i32 = arith.constant 0 : i32
    %c0_i32_0 = arith.constant 0 : i32
    %c0_i32_1 = arith.constant 0 : i32
    return %c0_i32, %c0_i32_0 : i32, i32
  }
  func.func @transform_5(%arg0: i32) -> (i32, i32) {
    %c0_i32 = arith.constant 0 : i32
    %c0_i32_0 = arith.constant 0 : i32
    %c0_i32_1 = arith.constant 0 : i32
    return %c0_i32, %c0_i32_0 : i32, i32
  }
  func.func @transform_6(%arg0: i32) -> (i32, i32) {
    %c0_i32 = arith.constant 0 : i32
    %c0_i32_0 = arith.constant 0 : i32
    return %arg0, %c0_i32 : i32, i32
  }
  func.func @transform_7(%arg0: i32) -> (i32, i32) {
    %c0_i32 = arith.constant 0 : i32
    %c0_i32_0 = arith.constant 0 : i32
    return %arg0, %c0_i32 : i32, i32
  }
}

</mosaic_0001>

<bundles_post_ra>
// kernel: fused_parallel_linear.1
= control target key start
LH: loop header
LB: loop body
LE: loop exit
PB: predicated region body
PF: predicated region fallthrough
CT: control target
= control target key end

     0   :  { %13 = vsyncpa [#allocation3], 0  ;;  %s745_s0 = inlined_call_operand.vmem [shape: bf16[8,256], index: 0, kind: input, shape index: {}]   ;;  %s746_s1 = inlined_call_operand.vmem [shape: bf16[8,256], index: 1, kind: input, shape index: {}]   ;;  %s747_s2 = inlined_call_operand.vmem [shape: bf16[256,60], index: 2, kind: input, shape index: {}]   ;;  %s748_s3 = inlined_call_operand.vmem [shape: bf16[256,60], index: 3, kind: input, shape index: {}]   ;;  %s749_s4 = inlined_call_operand.vmem [shape: f32[1,60], index: 4, kind: input, shape index: {}]   ;;  %s750_s5 = inlined_call_operand.vmem [shape: f32[1,60], index: 5, kind: input, shape index: {}]   ;;  %s751_s6 = inlined_call_operand.hbm [shape: f32[8,60], index: 6, kind: output, shape index: {0}]   ;;  %s752_s7 = inlined_call_operand.hbm [shape: f32[8,60], index: 7, kind: output, shape index: {1}]  }
   0x1   :  { %v509_v0 = vld [vmem:[%s747_s2 + $0x78] sm:$0xff]   ;;  %v513_v4 = vld [vmem:[%s747_s2 + $0x70] sm:$0xff]   ;;  %v517_v8 = vld [vmem:[%s747_s2 + $0x68] sm:$0xff]  }
   0x2   :  { %v510_v1 = vld [vmem:[%s748_s3 + $0x78] sm:$0xff]   ;;  %463 = vmatprep.subr.bf16.mxu0 %v509_v0  ;;  %v514_v5 = vld [vmem:[%s748_s3 + $0x70] sm:$0xff]   ;;  %v518_v9 = vld [vmem:[%s748_s3 + $0x68] sm:$0xff]  }
   0x3   :  { %v511_v2 = vld [vmem:[%s747_s2 + $0x38] sm:$0xff]   ;;  %485 = vmatprep.subr.bf16.mxu1 %v510_v1  ;;  %v515_v6 = vld [vmem:[%s747_s2 + $0x30] sm:$0xff]   ;;  %v519_v10 = vld [vmem:[%s747_s2 + $0x28] sm:$0xff]  }
   0x4   :  { %v512_v3 = vld [vmem:[%s748_s3 + $0x38] sm:$0xff]   ;;  %464 = vmatpush3.bf16.msra.mxu0 %v511_v2  ;;  %v516_v7 = vld [vmem:[%s748_s3 + $0x30] sm:$0xff]   ;;  %v520_v11 = vld [vmem:[%s748_s3 + $0x28] sm:$0xff]  }
   0x5   :  { %486 = vmatpush3.bf16.msra.mxu1 %v512_v3  ;;  %465 = vmatprep.subr.bf16.mxu0 %v513_v4  ;;  %v521_v12 = vld [vmem:[%s747_s2 + $0x60] sm:$0xff]   ;;  %v525_v16 = vld [vmem:[%s747_s2 + $0x58] sm:$0xff]   ;;  %v529_v20 = vld [vmem:[%s747_s2 + $0x50] sm:$0xff]  }
   0x6   :  { %487 = vmatprep.subr.bf16.mxu1 %v514_v5  ;;  %v522_v13 = vld [vmem:[%s748_s3 + $0x60] sm:$0xff]   ;;  %v526_v17 = vld [vmem:[%s748_s3 + $0x58] sm:$0xff]   ;;  %v530_v21 = vld [vmem:[%s748_s3 + $0x50] sm:$0xff]  }
   0x7   :  { %v523_v14 = vld [vmem:[%s747_s2 + $0x20] sm:$0xff]   ;;  %v527_v18 = vld [vmem:[%s747_s2 + $0x18] sm:$0xff]   ;;  %v531_v22 = vld [vmem:[%s747_s2 + $0x10] sm:$0xff]  }
   0x8   :  { %466 = vmatpush3.bf16.msra.mxu0 %v515_v6  ;;  %v524_v15 = vld [vmem:[%s748_s3 + $0x20] sm:$0xff]   ;;  %v528_v19 = vld [vmem:[%s748_s3 + $0x18] sm:$0xff]   ;;  %v532_v23 = vld [vmem:[%s748_s3 + $0x10] sm:$0xff]  }
   0x9   :  { %488 = vmatpush3.bf16.msra.mxu1 %v516_v7  ;;  %467 = vmatprep.subr.bf16.mxu0 %v517_v8  ;;  %v533_v24 = vld [vmem:[%s747_s2 + $0x48] sm:$0xff]   ;;  %v537_v28 = vld [vmem:[%s747_s2 + $0x40] sm:$0xff]  }
   0xa   :  { %489 = vmatprep.subr.bf16.mxu1 %v518_v9  ;;  %v534_v25 = vld [vmem:[%s748_s3 + $0x48] sm:$0xff]   ;;  %v538_v29 = vld [vmem:[%s748_s3 + $0x40] sm:$0xff]  }
   0xb   :  { %v535_v26 = vld [vmem:[%s747_s2 + $0x8] sm:$0xff]   ;;  %v539_v30 = vld [vmem:[%s747_s2] sm:$0xff]  }
   0xc   :  { %468 = vmatpush3.bf16.msra.mxu0 %v519_v10  ;;  %v536_v27 = vld [vmem:[%s748_s3 + $0x8] sm:$0xff]   ;;  %v540_v31 = vld [vmem:[%s748_s3] sm:$0xff]  }
   0xd   :  { %490 = vmatpush3.bf16.msra.mxu1 %v520_v11  ;;  %469 = vmatprep.subr.bf16.mxu0 %v521_v12  ;;  %v28_v32 = vld [vmem:[%s745_s0] sm:$0xff] }
   0xe   :  { %491 = vmatprep.subr.bf16.mxu1 %v522_v13  ;;  %v213_v33 = vld [vmem:[%s746_s1] sm:$0xff] }
  0x10   :  { %470 = vmatpush3.bf16.msra.mxu0 %v523_v14 }
  0x11   :  { %492 = vmatpush3.bf16.msra.mxu1 %v524_v15  ;;  %471 = vmatprep.subr.bf16.mxu0 %v525_v16 }
  0x12   :  { %493 = vmatprep.subr.bf16.mxu1 %v526_v17 }
  0x14   :  { %472 = vmatpush3.bf16.msra.mxu0 %v527_v18 }
  0x15   :  { %494 = vmatpush3.bf16.msra.mxu1 %v528_v19  ;;  %473 = vmatprep.subr.bf16.mxu0 %v529_v20 }
  0x16   :  { %495 = vmatprep.subr.bf16.mxu1 %v530_v21 }
  0x18   :  { %474 = vmatpush3.bf16.msra.mxu0 %v531_v22 }
  0x19   :  { %496 = vmatpush3.bf16.msra.mxu1 %v532_v23  ;;  %475 = vmatprep.subr.bf16.mxu0 %v533_v24 }
  0x1a   :  { %497 = vmatprep.subr.bf16.mxu1 %v534_v25 }
  0x1c   :  { %476 = vmatpush3.bf16.msra.mxu0 %v535_v26 }
  0x1d   :  { %498 = vmatpush3.bf16.msra.mxu1 %v536_v27  ;;  %477 = vmatprep.subr.bf16.mxu0 %v537_v28 }
  0x1e   :  { %499 = vmatprep.subr.bf16.mxu1 %v538_v29 }
  0x20   :  { %478 = vmatpush3.bf16.msra.mxu0 %v539_v30 }
  0x21   :  { %14 = vsyncpa [#allocation5], 0  ;;  %500 = vmatpush3.bf16.msra.mxu1 %v540_v31  ;;  %v426_v34 = vcombine.low %v28_v32, %v28_v32  ;;  %v427_v35 = vcombine.high %v28_v32, %v28_v32  ;;  %v445_v36 = vcombine.low %v213_v33, %v213_v33  ;;  %v446_v37 = vcombine.high %v213_v33, %v213_v33  ;;  %v444_v41 = vld [vmem:[%s750_s5] ss:$0 sm:$0xff]  ;;  %s589_s23 = smov [#allocation2]   ;;  %s590_s25 = smov [#allocation4]  }
  0x22   :  { %v425_v43 = vld [vmem:[%s749_s4] ss:$0 sm:$0xff]  ;;  %s403_s24 = sshll.u32 %s589_s23, 4  ;;  %s413_s26 = sshll.u32 %s590_s25, 4  ;;  %vm211_vm0 = vcmask 490496   ;;  %s404_s24 = int_to_ptr.vmem [resolvable:$true] %s403_s24  ;;  %s414_s26 = int_to_ptr.vmem [resolvable:$true] %s413_s26 }
  0x23   :  { %203 = vmatprep.mubr.bf16.mxu0 %v427_v35  ;;  %388 = vmatprep.mubr.bf16.mxu1 %v446_v37  ;;  %s545_s5 = scalar_lea.vmem %s404_s24, 128  ;;  %p550_p1 = scmp.lt.s32.totalorder %s404_s24, %s404_s24 }
  0x24   :  { %204 = vmatmul.mubr.bf16.vlgmr.msra.gmra.mxu0 %v426_v34  ;;  %389 = vmatmul.mubr.bf16.vlgmr.msra.gmra.mxu1 %v445_v36  ;;  %p546_p0 = scmp.ne.s32.totalorder %s404_s24, %s545_s5  ;;  %p551_p2 = scmp.lt.s32.totalorder %s545_s5, %s545_s5 }
  0x26   :  { %p552_p3 = por %p551_p2, %p550_p1 }
  0x28   :  { %p553_p4 = pnand %p552_p3, %p546_p0 }
  0xe4   :  { %v479_v38 = vpop.f32.mrf.mxu0  ;;  %v501_v39 = vpop.f32.mrf.mxu1 }
  0xe6   :  { %v480_v40 = vpop.f32.mrf.mxu0  ;;  %v502_v42 = vpop.f32.mrf.mxu1 }
  0xe7   :  { %v481_v44 = vadd.f32 %v480_v40, %v479_v38  ;;  %v503_v45 = vadd.f32 %v502_v42, %v501_v39 }
  0xe8   :  { %v482_v46 = vpop.f32.mrf.mxu0  ;;  %v504_v47 = vpop.f32.mrf.mxu1 }
  0xe9   :  { %v391_v48 = vadd.f32 %v503_v45, %v444_v41  ;;  %v206_v49 = vadd.f32 %v481_v44, %v425_v43 }
  0xea   :  { %v483_v50 = vpop.f32.mrf.mxu0  ;;  %v505_v51 = vpop.f32.mrf.mxu1 }
  0xeb   :  { %212 = vst.msk [vmem:[#allocation2] sm:$0xff] %vm211_vm0, %v206_v49  ;;  %396 = vst.msk [vmem:[#allocation4] sm:$0xff] %vm211_vm0, %v391_v48 }
  0xec   :  { %556 = shalt.err (!%p553_p4)
}
  0xed   :  { %406 = dma.vmem_to_hbm [thread:$0]  %s404_s24, 128, %s751_s6, [#allocation3]  }
  0xee   :  { %s565_s28 = scalar_lea.vmem %s414_s26, 128  ;;  %p570_p6 = scmp.lt.s32.totalorder %s414_s26, %s414_s26 }
  0xef   :  { %p566_p5 = scmp.ne.s32.totalorder %s414_s26, %s565_s28  ;;  %p571_p7 = scmp.lt.s32.totalorder %s565_s28, %s565_s28 }
  0xf1   :  { %p572_p8 = por %p571_p7, %p570_p6 }
  0xf3   :  { %p573_p9 = pnand %p572_p8, %p566_p5 }
  0xf5   :  { %576 = shalt.err (!%p573_p9)
}
  0xf6   :  { %416 = dma.vmem_to_hbm [thread:$0]  %s414_s26, 128, %s752_s7, [#allocation5]  }
  0xf7   :  { %585 = dma.done.wait [#allocation3], 128  }
  0xf8   :  { %586 = vsyncadd [#allocation3], 4294967168 }
  0xf9   :  { %587 = dma.done.wait [#allocation5], 128  }
  0xfa   :  { %588 = vsyncadd [#allocation5], 4294967168 }
  0xfb   :  { %423 = vsyncpa [#allocation3], 1 }
  0xfc   :  { %424 = vsyncpa [#allocation5], 1 }

</bundles_post_ra>
